<compile_context>
chip_gen: v5e
topology: v5e:2x2
jax: 0.10.0
libtpu: 0.0.40
codegen_flags: <defaults>
</compile_context>

<pallas_src>
import functools

import jax
import jax.numpy as jnp
from jax.experimental import pallas as pl
from jax.experimental.pallas import tpu as pltpu

BF16 = jnp.bfloat16


# ----------------------------------------------------------------------------
# Per-generation VMEM budget + row-tile selection
# ----------------------------------------------------------------------------

def _vmem_limit_bytes():
    """Scoped-VMEM limit: ~3/4 of physical (128 MiB v5e/v6e, 64 MiB v7x)."""
    try:
        cap = int(pltpu.get_tpu_info().vmem_capacity_bytes)
        return int(min(cap * 3 // 4, 96 * 1024 * 1024))
    except Exception:
        return 48 * 1024 * 1024


_VMEM_LIMIT = _vmem_limit_bytes()


def _pick_row_tile(h, w, c_max, *, cap=32, budget=None, s_len=512, nh=128):
    """Largest TH (divisor of H, <= cap) whose fused-ACE working set fits the budget.

    # TODO(synk): pad H instead of degrading to a per-row grid when H is prime.
    """
    if budget is None:
        budget = _VMEM_LIMIT // 3
    best = 1
    for th in range(1, min(cap, h) + 1):
        if h % th:
            continue
        est = (4 * th * w * c_max * 4                      # x + out tiles, double-buffered
               + (th + 2) * (w + 2) * (s_len + nh) * 2     # [mid | actv] slab (bf16)
               + (th + 4) * (w + 4) * 128 * 4              # seg slab (lane-padded, f32)
               + 2 * th * w * 2 * c_max * 4)               # gamma|beta f32 accumulator
        if est <= budget:
            best = th
    return best


# ----------------------------------------------------------------------------
# Plain-JAX helpers (tiny / O(1/TH) extra data)
# ----------------------------------------------------------------------------

def nearest_resize_to_nhwc(seg_nchw, h, w):
    """F.interpolate(segmap, size=(h, w), mode='nearest'), returned as NHWC float32."""
    _, _, hs, ws = seg_nchw.shape
    hi = (jnp.arange(h) * hs) // h
    wi = (jnp.arange(w) * ws) // w
    seg = seg_nchw[:, :, hi[:, None], wi[None, :]]
    return jnp.transpose(seg, (0, 2, 3, 1)).astype(jnp.float32)


def make_row_halo(xp, th, halo):
    """Rows just above / below each row tile (zeros outside the image).

    xp: (B, H, Wp, C) -> (B, T, 2*halo, Wp, C).  Only ~2*halo/TH of the input.
    Row order: [start-halo .. start-1, end .. end+halo-1].
    """
    b, h, wp, c = xp.shape
    t = h // th
    t_idx = jnp.arange(t)
    rows = []
    for d in range(halo, 0, -1):                           # rows above the tile
        src = t_idx * th - d
        r = xp[:, jnp.maximum(src, 0)]
        rows.append(jnp.where((src >= 0)[None, :, None, None], r, 0.0))
    for d in range(halo):                                  # rows below the tile
        src = (t_idx + 1) * th + d
        r = xp[:, jnp.minimum(src, h - 1)]
        rows.append(jnp.where((src <= h - 1)[None, :, None, None], r, 0.0))
    return jnp.stack(rows, axis=2)                         # (B, T, 2*halo, Wp, C)


def pad_and_halo(x, th, halo=1):
    """`halo`-px zero *width* pad (keeps in-kernel scratch stores aligned; only
    2*halo/W extra columns) + precomputed row halos."""
    xp = jnp.pad(x, ((0, 0), (0, 0), (halo, halo), (0, 0)))
    return xp, make_row_halo(xp, th, halo)


def finalize_stats(partials, hw):
    """(B, T, 2, C) per-tile [sum, sumsq] partials -> (B, 2, C) [mean, rsqrt(var+eps)]."""
    s = jnp.sum(partials, axis=1)
    mean = s[:, 0] / hw
    var = jnp.maximum(s[:, 1] / hw - mean * mean, 0.0)     # clamp E[x^2]-E[x]^2 >= 0
    return jnp.stack([mean, jax.lax.rsqrt(var + 1e-5)], axis=1)


# ----------------------------------------------------------------------------
# Instance-norm statistics (mean, rsqrt(var + eps)) per (batch, channel)
# ----------------------------------------------------------------------------

def _instnorm_stats_kernel(x_ref, o_ref, acc_ref, *, hw):
    t = pl.program_id(1)

    @pl.when(t == 0)
    def _():
        acc_ref[...] = jnp.zeros_like(acc_ref)

    th, w, c = x_ref.shape[1:]
    x2 = x_ref[0].reshape(th * w, c)
    acc_ref[0:1, :] += jnp.sum(x2, axis=0, keepdims=True)
    acc_ref[1:2, :] += jnp.sum(x2 * x2, axis=0, keepdims=True)

    @pl.when(t == pl.num_programs(1) - 1)
    def _():
        mean = acc_ref[0:1, :] * (1.0 / hw)
        var = jnp.maximum(acc_ref[1:2, :] * (1.0 / hw) - mean * mean, 0.0)
        o_ref[0, 0:1, :] = mean
        o_ref[0, 1:2, :] = jax.lax.rsqrt(var + 1e-5)


def instnorm_stats(x, th):
    b, h, w, c = x.shape
    t = h // th
    kern = functools.partial(_instnorm_stats_kernel, hw=float(h * w))
    return pl.pallas_call(
        kern,
        out_shape=jax.ShapeDtypeStruct((b, 2, c), jnp.float32),
        grid=(b, t),
        in_specs=[pl.BlockSpec((1, th, w, c), lambda i, j: (i, j, 0, 0))],
        out_specs=pl.BlockSpec((1, 2, c), lambda i, j: (i, 0, 0)),
        scratch_shapes=[pltpu.VMEM((2, c), jnp.float32)],
        compiler_params=pltpu.CompilerParams(
            dimension_semantics=("parallel", "arbitrary"),
            vmem_limit_bytes=_VMEM_LIMIT),
    )(x)


# ----------------------------------------------------------------------------
# Row-tiled 3x3 conv (stride 1, pad 1): bf16 MXU operands, f32 accumulation,
# fused leaky-ReLU input / ReLU output / residual add / instance-norm partials.
# ----------------------------------------------------------------------------

def _conv3x3_kernel(*refs, TH, W, input_act, output_act, has_residual, emit_stats):
    x_ref, halo_ref, w_ref, b_ref = refs[0:4]
    n = 4
    res_ref = None
    if has_residual:
        res_ref = refs[n]
        n += 1
    o_ref = refs[n]
    n += 1
    st_ref = None
    if emit_stats:
        st_ref = refs[n]
        n += 1
    slab = refs[n]

    cin = x_ref.shape[-1]
    cout = o_ref.shape[-1]

    main = x_ref[0]                 # (TH, W+2, Cin) f32, width already zero-padded
    top = halo_ref[0, 0, 0]         # (W+2, Cin)
    bot = halo_ref[0, 0, 1]
    if input_act == "leaky":
        # Hoisted out of the 9-tap loop; leaky_relu(0) == 0 so padding stays exact.
        main = jnp.where(main >= 0, main, 0.2 * main)
        top = jnp.where(top >= 0, top, 0.2 * top)
        bot = jnp.where(bot >= 0, bot, 0.2 * bot)
    slab[0] = top.astype(BF16)
    slab[1:TH + 1] = main.astype(BF16)
    slab[TH + 1] = bot.astype(BF16)

    acc = jnp.zeros((TH * W, cout), jnp.float32)
    for kh in range(3):
        for kw in range(3):
            patch = slab[kh:kh + TH, kw:kw + W, :].reshape(TH * W, cin)
            acc = acc + jnp.dot(patch, w_ref[kh, kw],
                                preferred_element_type=jnp.float32)
    acc = acc + b_ref[...]
    if output_act == "relu":
        acc = jnp.maximum(acc, 0.0)
    if has_residual:
        acc = acc + res_ref[0].reshape(TH * W, cout)
    if emit_stats:
        st_ref[0, 0, 0:1, :] = jnp.sum(acc, axis=0, keepdims=True)
        st_ref[0, 0, 1:2, :] = jnp.sum(acc * acc, axis=0, keepdims=True)
    o_ref[0] = acc.reshape(TH, W, cout)


def conv3x3_nhwc(xp, halo, w, b, th, *, input_act=None, output_act=None,
                 residual=None, emit_stats=False):
    """3x3 conv over a width-padded NHWC input with precomputed 1-row halos.

    xp: (B, H, W+2, Cin)   halo: (B, T, 2, W+2, Cin)
    Fused options: leaky-ReLU on the input, ReLU on the output, residual add,
    per-tile instance-norm partial sums ((B, T, 2, Cout) second output).
    """
    bsz, h, wp, cin = xp.shape
    wid = wp - 2
    cout = w.shape[-1]
    t = h // th
    wq = w.astype(BF16)
    b2 = b.reshape(1, cout).astype(jnp.float32)
    has_res = residual is not None
    kern = functools.partial(_conv3x3_kernel, TH=th, W=wid, input_act=input_act,
                             output_act=output_act, has_residual=has_res,
                             emit_stats=emit_stats)
    in_specs = [
        pl.BlockSpec((1, th, wp, cin), lambda i, j: (i, j, 0, 0)),
        pl.BlockSpec((1, 1, 2, wp, cin), lambda i, j: (i, j, 0, 0, 0)),
        pl.BlockSpec((3, 3, cin, cout), lambda i, j: (0, 0, 0, 0)),
        pl.BlockSpec((1, cout), lambda i, j: (0, 0)),
    ]
    args = [xp, halo, wq, b2]
    if has_res:
        in_specs.append(pl.BlockSpec((1, th, wid, cout), lambda i, j: (i, j, 0, 0)))
        args.append(residual)

    out_shapes = [jax.ShapeDtypeStruct((bsz, h, wid, cout), jnp.float32)]
    out_specs = [pl.BlockSpec((1, th, wid, cout), lambda i, j: (i, j, 0, 0))]
    if emit_stats:
        out_shapes.append(jax.ShapeDtypeStruct((bsz, t, 2, cout), jnp.float32))
        out_specs.append(pl.BlockSpec((1, 1, 2, cout), lambda i, j: (i, j, 0, 0)))

    flops = 2 * bsz * h * wid * 9 * cin * cout
    bytes_accessed = ((xp.size + halo.size) * 4 + wq.size * 2
                      + bsz * h * wid * cout * 4
                      + (residual.size * 4 if has_res else 0))
    out = pl.pallas_call(
        kern,
        out_shape=tuple(out_shapes) if emit_stats else out_shapes[0],
        grid=(bsz, t),
        in_specs=in_specs,
        out_specs=tuple(out_specs) if emit_stats else out_specs[0],
        scratch_shapes=[pltpu.VMEM((th + 2, wp, cin), BF16)],
        compiler_params=pltpu.CompilerParams(
            dimension_semantics=("parallel", "parallel"),
            vmem_limit_bytes=_VMEM_LIMIT),
        cost_estimate=pl.CostEstimate(flops=int(flops), transcendentals=0,
                                      bytes_accessed=int(bytes_accessed)),
    )(*args)
    return out


# ----------------------------------------------------------------------------
# Fused ACE kernel:
#   seg slab (2-row halo) -> SPADE shared trunk conv+ReLU (in-kernel, masked to the
#   image) and one-hot "last class wins" middle_avg (one matmul) -> combined
#   [middle_avg | actv] bf16 slab -> 9 gamma|beta matmuls with the blend coefficients
#   pre-folded into the weights -> instance-norm apply + modulation epilogue
#   (+ optional fused 1x1 learned-shortcut conv).
# ----------------------------------------------------------------------------

def _ace_fused_kernel(stats_ref, x_ref, seg_ref, seg_halo_ref, mu_ref,
                      w_tr_ref, b_tr_ref, w_gb_ref, b_gb_ref, *rest,
                      TH, W, has_shortcut):
    if has_shortcut:
        w_s_ref, o_ref, seg_slab, comb_slab = rest
    else:
        o_ref, seg_slab, comb_slab = rest

    s_len = mu_ref.shape[-1]
    nh = w_tr_ref.shape[-1]
    nc = seg_ref.shape[-1]
    c = x_ref.shape[-1]
    c2 = w_gb_ref.shape[-1]
    m2 = (TH + 2) * (W + 2)
    m = TH * W

    # --- seg slab: rows [start-2 .. start+TH+1], width padded by 2 ------------
    seg_slab[0:2] = seg_halo_ref[0, 0, 0:2]
    seg_slab[2:TH + 2] = seg_ref[0]
    seg_slab[TH + 2:TH + 4] = seg_halo_ref[0, 0, 2:4]

    # --- middle_avg for the (TH+2, W+2) window: one one-hot-selection matmul --
    # masked_scatter_ semantics: the *last* nonzero segmap channel wins; pixels
    # with no class stay zero (all-zero selection row -> zero output row).
    seg_in = seg_slab[1:TH + 3, 1:W + 3, :].reshape(m2, nc)
    nz = seg_in != 0.0
    jidx = jax.lax.broadcasted_iota(jnp.int32, (m2, nc), 1)
    last = jnp.max(jnp.where(nz, jidx, -1), axis=1, keepdims=True)
    sel = (jidx == last).astype(BF16)
    mid = jnp.dot(sel, mu_ref[0].astype(BF16),
                  preferred_element_type=jnp.float32)               # (m2, S)
    comb_slab[:, :, 0:s_len] = mid.reshape(TH + 2, W + 2, s_len).astype(BF16)

    # --- SPADE shared trunk conv (3x3 + ReLU) for the same window -------------
    acc_tr = jnp.zeros((m2, nh), jnp.float32)
    for kh in range(3):
        for kw in range(3):
            p = seg_slab[kh:kh + TH + 2, kw:kw + W + 2, :].reshape(m2, nc)
            acc_tr = acc_tr + jnp.dot(p.astype(BF16), w_tr_ref[kh, kw],
                                      preferred_element_type=jnp.float32)
    actv = jnp.maximum(acc_tr + b_tr_ref[...], 0.0)
    # Zero actv outside the image so the gamma/beta convs see PyTorch's zero padding
    # (the trunk bias + neighbour spill-in would otherwise leak into border taps).
    start = pl.program_id(1) * TH
    h_img = pl.num_programs(1) * TH
    row = jax.lax.broadcasted_iota(jnp.int32, (TH + 2, W + 2), 0) + (start - 1)
    col = jax.lax.broadcasted_iota(jnp.int32, (TH + 2, W + 2), 1)
    valid = ((row >= 0) & (row < h_img) & (col >= 1) & (col <= W)).reshape(m2, 1)
    actv = jnp.where(valid, actv, 0.0)
    comb_slab[:, :, s_len:s_len + nh] = actv.reshape(TH + 2, W + 2, nh).astype(BF16)

    # --- gamma|beta conv over [middle_avg | actv]; blend pre-folded -> 1 acc ---
    acc = jnp.zeros((m, c2), jnp.float32)
    for kh in range(3):
        for kw in range(3):
            p = comb_slab[kh:kh + TH, kw:kw + W, :].reshape(m, s_len + nh)
            acc = acc + jnp.dot(p, w_gb_ref[kh, kw],
                                preferred_element_type=jnp.float32)
    acc = acc + b_gb_ref[...]
    gamma = acc[:, 0:c]
    beta = acc[:, c:2 * c]

    # --- instance-norm apply + modulation (+ optional fused 1x1 shortcut) -----
    st = stats_ref[0]                                   # (2, C): mean, rsqrt(var+eps)
    xn = (x_ref[0].reshape(m, c) - st[0:1, :]) * st[1:2, :]
    y = xn * (1.0 + gamma) + beta
    if has_shortcut:
        y = jnp.dot(y.astype(BF16), w_s_ref[...],
                    preferred_element_type=jnp.float32)
    o_ref[0] = y.reshape(TH, W, o_ref.shape[-1])


def ace_forward(p, x, stats, seg2p, seg_halo2, style_codes, th, *, shortcut_w=None):
    """ACE.forward (use_rgb=True, status != 'UI_mode').  x is NHWC (B, H, W, C).

    `stats` is the precomputed (B, 2, C) [mean, rsqrt(var+eps)] of x.
    noise_var is zero-initialized in __init__ -> the added noise term is exactly 0.
    """
    bsz, h, wid, c = x.shape
    t = h // th
    nc = seg2p.shape[-1]
    s_len = style_codes.shape[-1]
    nh = p["spade_shared_w"].shape[-1]

    # relu(fc_mu_j(style_codes[:, j])): tiny (nc x 512x512) batched matmul -> XLA.
    mu = jax.nn.relu(jnp.einsum("bjs,jst->bjt", style_codes, p["fc_w"])
                     + p["fc_b"][None])                             # (B, nc, S)

    # Fold sigmoid(blending_*) into the weights (computed, not baked) and stack
    # gamma|beta along the output dim and mid|actv along the contraction dim.
    a_g = jax.nn.sigmoid(p["blending_gamma"])[0]
    a_b = jax.nn.sigmoid(p["blending_beta"])[0]
    w_avg = jnp.concatenate([a_g * p["conv_gamma_w"],
                             a_b * p["conv_beta_w"]], axis=-1)      # (3,3,S,2C)
    w_sp = jnp.concatenate([(1.0 - a_g) * p["spade_gamma_w"],
                            (1.0 - a_b) * p["spade_beta_w"]], axis=-1)  # (3,3,nh,2C)
    w_gb = jnp.concatenate([w_avg, w_sp], axis=2).astype(BF16)      # (3,3,S+nh,2C)
    b_gb = jnp.concatenate(
        [a_g * p["conv_gamma_b"] + (1.0 - a_g) * p["spade_gamma_b"],
         a_b * p["conv_beta_b"] + (1.0 - a_b) * p["spade_beta_b"]]
    ).reshape(1, 2 * c).astype(jnp.float32)
    w_tr = p["spade_shared_w"].astype(BF16)                         # (3,3,nc,nh)
    b_tr = p["spade_shared_b"].reshape(1, nh).astype(jnp.float32)

    has_sc = shortcut_w is not None
    cout = shortcut_w.shape[-1] if has_sc else c

    in_specs = [
        pl.BlockSpec((1, 2, c), lambda i, j: (i, 0, 0)),
        pl.BlockSpec((1, th, wid, c), lambda i, j: (i, j, 0, 0)),
        pl.BlockSpec((1, th, wid + 4, nc), lambda i, j: (i, j, 0, 0)),
        pl.BlockSpec((1, 1, 4, wid + 4, nc), lambda i, j: (i, j, 0, 0, 0)),
        pl.BlockSpec((1, nc, s_len), lambda i, j: (i, 0, 0)),
        pl.BlockSpec((3, 3, nc, nh), lambda i, j: (0, 0, 0, 0)),
        pl.BlockSpec((1, nh), lambda i, j: (0, 0)),
        pl.BlockSpec((3, 3, s_len + nh, 2 * c), lambda i, j: (0, 0, 0, 0)),
        pl.BlockSpec((1, 2 * c), lambda i, j: (0, 0)),
    ]
    args = [stats, x, seg2p, seg_halo2, mu, w_tr, b_tr, w_gb, b_gb]
    if has_sc:
        in_specs.append(pl.BlockSpec((c, cout), lambda i, j: (0, 0)))
        args.append(shortcut_w.astype(BF16))

    m2_total = bsz * (h + 2) * (wid + 2)
    flops = 2 * (m2_total * nc * s_len
                 + m2_total * 9 * nc * nh
                 + bsz * h * wid * 9 * (s_len + nh) * 2 * c
                 + (bsz * h * wid * c * cout if has_sc else 0))
    bytes_accessed = (x.size * 4 + bsz * h * wid * cout * 4 + seg2p.size * 4
                      + seg_halo2.size * 4 + mu.size * 4 + stats.size * 4
                      + w_gb.size * 2 + w_tr.size * 2)

    kern = functools.partial(_ace_fused_kernel, TH=th, W=wid, has_shortcut=has_sc)
    return pl.pallas_call(
        kern,
        out_shape=jax.ShapeDtypeStruct((bsz, h, wid, cout), jnp.float32),
        grid=(bsz, t),
        in_specs=in_specs,
        out_specs=pl.BlockSpec((1, th, wid, cout), lambda i, j: (i, j, 0, 0)),
        scratch_shapes=[
            pltpu.VMEM((th + 4, wid + 4, nc), jnp.float32),
            pltpu.VMEM((th + 2, wid + 2, s_len + nh), BF16),
        ],
        compiler_params=pltpu.CompilerParams(
            dimension_semantics=("parallel", "parallel"),
            vmem_limit_bytes=_VMEM_LIMIT),
        cost_estimate=pl.CostEstimate(flops=int(flops), transcendentals=0,
                                      bytes_accessed=int(bytes_accessed)),
    )(*args)


# ----------------------------------------------------------------------------
# SPADEResnetBlock forward
# ----------------------------------------------------------------------------

def spade_resnet_block(params, x_nchw, seg_nchw, style_codes, *, row_tile=32):
    """SPADEResnetBlock.forward(x, seg, style_codes) (status=None, use_rgb=True)."""
    x = jnp.transpose(x_nchw, (0, 2, 3, 1)).astype(jnp.float32)     # NCHW -> NHWC
    bsz, h, wid, fin = x.shape
    fout = params["conv_1_w"].shape[-1]
    th = _pick_row_tile(h, wid, max(fin, fout), cap=row_tile)

    seg = nearest_resize_to_nhwc(seg_nchw, h, wid)                  # (B, H, W, nc)
    seg2p, seg_halo2 = pad_and_halo(seg, th, halo=2)                # 2-row halo (trunk fused)

    stats_x = instnorm_stats(x, th)                                 # shared by ace_0 / ace_s

    if params["learned_shortcut"]:
        # ace_s with the 1x1 learned-shortcut conv fused into its epilogue.
        x_s = ace_forward(params["ace_s"], x, stats_x, seg2p, seg_halo2,
                          style_codes, th, shortcut_w=params["conv_s_w"])
    else:
        x_s = x

    dx = ace_forward(params["ace_0"], x, stats_x, seg2p, seg_halo2, style_codes, th)
    dxp, dxh = pad_and_halo(dx, th, halo=1)
    # conv_0: fused leaky-ReLU input + per-tile instance-norm partial sums for ace_1.
    dx, dx_stats_part = conv3x3_nhwc(dxp, dxh, params["conv_0_w"], params["conv_0_b"],
                                     th, input_act="leaky", emit_stats=True)
    dx_stats = finalize_stats(dx_stats_part, float(h * wid))

    dx = ace_forward(params["ace_1"], dx, dx_stats, seg2p, seg_halo2, style_codes, th)
    dxp, dxh = pad_and_halo(dx, th, halo=1)
    # conv_1 with the leaky-ReLU input and the residual add fused into its epilogue.
    out = conv3x3_nhwc(dxp, dxh, params["conv_1_w"], params["conv_1_b"], th,
                       input_act="leaky", residual=x_s)
    return jnp.transpose(out, (0, 3, 1, 2))                         # back to NCHW


# ----------------------------------------------------------------------------
# Deterministic synthetic parameters (shapes per the module __init__)
# ----------------------------------------------------------------------------

def _init_ace_params(key, norm_nc, label_nc, nhidden=128, s_len=512):
    keys = jax.random.split(key, 12)

    def w(k, shape, scale):
        return scale * jax.random.normal(k, shape, jnp.float32)

    return dict(
        # Only the first `label_nc` of the 19 fc_mu layers are ever used.
        fc_w=w(keys[0], (label_nc, s_len, s_len), 0.02),
        fc_b=w(keys[1], (label_nc, s_len), 0.02),
        conv_gamma_w=w(keys[2], (3, 3, s_len, norm_nc), 0.02),
        conv_gamma_b=w(keys[3], (norm_nc,), 0.02),
        conv_beta_w=w(keys[4], (3, 3, s_len, norm_nc), 0.02),
        conv_beta_b=w(keys[5], (norm_nc,), 0.02),
        spade_shared_w=w(keys[6], (3, 3, label_nc, nhidden), 0.05),
        spade_shared_b=w(keys[7], (nhidden,), 0.05),
        spade_gamma_w=w(keys[8], (3, 3, nhidden, norm_nc), 0.05),
        spade_gamma_b=w(keys[9], (norm_nc,), 0.05),
        spade_beta_w=w(keys[10], (3, 3, nhidden, norm_nc), 0.05),
        spade_beta_b=w(keys[11], (norm_nc,), 0.05),
        blending_gamma=jnp.zeros((1,), jnp.float32),   # exactly as in __init__
        blending_beta=jnp.zeros((1,), jnp.float32),
        noise_var=jnp.zeros((norm_nc,), jnp.float32),  # zero -> noise term == 0
    )


def init_block_params(key, fin, fout, input_nc):
    fmiddle = min(fin, fout)
    learned = fin != fout
    keys = jax.random.split(key, 8)
    p = dict(
        learned_shortcut=learned,
        conv_0_w=0.05 * jax.random.normal(keys[0], (3, 3, fin, fmiddle), jnp.float32),
        conv_0_b=0.05 * jax.random.normal(keys[1], (fmiddle,), jnp.float32),
        conv_1_w=0.05 * jax.random.normal(keys[2], (3, 3, fmiddle, fout), jnp.float32),
        conv_1_b=0.05 * jax.random.normal(keys[3], (fout,), jnp.float32),
        ace_0=_init_ace_params(keys[4], fin, input_nc),
        ace_1=_init_ace_params(keys[5], fmiddle, input_nc),
    )
    if learned:
        p["conv_s_w"] = 0.05 * jax.random.normal(keys[6], (fin, fout), jnp.float32)
        p["ace_s"] = _init_ace_params(keys[7], fin, input_nc)
    return p


# ----------------------------------------------------------------------------
# Demo
# ----------------------------------------------------------------------------

if __name__ == "__main__":
    B, fin, fout, input_nc = 2, 8, 16, 3       # fin != fout -> learned shortcut path
    H = W = 16
    S = 512                                     # style_length is fixed to 512

    key = jax.random.PRNGKey(0)
    k_par, k_x, k_seg, k_sty = jax.random.split(key, 4)

    params = init_block_params(k_par, fin, fout, input_nc)

    # PyTorch-convention NCHW inputs.
    x = jax.random.normal(k_x, (B, fin, H, W), jnp.float32)
    seg_labels = jax.random.randint(k_seg, (B, 8, 8), 0, input_nc)       # low-res segmap
    seg = jnp.transpose(jax.nn.one_hot(seg_labels, input_nc, dtype=jnp.float32),
                        (0, 3, 1, 2))                                    # (B, nc, 8, 8)
    style_codes = jax.random.normal(k_sty, (B, input_nc, S), jnp.float32)

    out = spade_resnet_block(params, x, seg, style_codes)
    out = jax.block_until_ready(out)
    assert out.shape == (B, fout, H, W), out.shape
    assert bool(jnp.all(jnp.isfinite(out)))
    print("KERNEL_OK")
</pallas_src>

<mosaic_0001>
module attributes {stable_mosaic.version = 11 : i64} {
  func.func @_instnorm_stats_kernel(%arg0: i32, %arg1: i32, %arg2: memref<1x16x16x8xf32, #tpu.memory_space<vmem>>, %arg3: memref<1x2x8xf32, #tpu.memory_space<vmem>>, %arg4: memref<2x8xf32, #tpu.memory_space<vmem>>) attributes {dimension_semantics = [#tpu.dimension_semantics<parallel>, #tpu.dimension_semantics<arbitrary>], iteration_bounds = array<i64: 2, 1>, scalar_prefetch = 0 : i64, scratch_operands = 1 : i64, tpu.core_type = #tpu.core_type<tc>, window_params = [{transform_indices = @transform_0, window_bounds = array<i64: 1, 16, 16, 8>}, {transform_indices = @transform_1, window_bounds = array<i64: 1, 2, 8>}]} {
    %c0_i32 = arith.constant 0 : i32
    %0 = arith.cmpi eq, %arg1, %c0_i32 : i32
    %1 = arith.extui %0 : i1 to i32
    %c0_i32_0 = arith.constant 0 : i32
    %2 = arith.cmpi ne, %1, %c0_i32_0 : i32
    scf.if %2 {
      %cst_14 = arith.constant 0.000000e+00 : f32
      %20 = vector.broadcast %cst_14 : f32 to vector<2x8xf32>
      %c0_15 = arith.constant 0 : index
      %c0_16 = arith.constant 0 : index
      %21 = vector.load %arg4[%c0_15, %c0_16] : memref<2x8xf32, #tpu.memory_space<vmem>>, vector<2x8xf32>
      tpu.vector_store %arg4[%c0_15, %c0_16], %20 {strides = array<i32>} : memref<2x8xf32, #tpu.memory_space<vmem>>, vector<2x8xf32>,
    } else {
    }
    %c0 = arith.constant 0 : index
    %c0_1 = arith.constant 0 : index
    %c0_2 = arith.constant 0 : index
    %c0_3 = arith.constant 0 : index
    %3 = vector.load %arg2[%c0, %c0_1, %c0_2, %c0_3] : memref<1x16x16x8xf32, #tpu.memory_space<vmem>>, vector<1x16x16x8xf32>
    %4 = vector.shape_cast %3 : vector<1x16x16x8xf32> to vector<16x16x8xf32>
    %5 = vector.shape_cast %4 : vector<16x16x8xf32> to vector<256x8xf32>
    %c0_4 = arith.constant 0 : index
    %c0_5 = arith.constant 0 : index
    %6 = vector.load %arg4[%c0_4, %c0_5] : memref<2x8xf32, #tpu.memory_space<vmem>>, vector<1x8xf32>
    %cst = arith.constant dense<0.000000e+00> : vector<8xf32>
    %7 = vector.multi_reduction <add>, %5, %cst [0] : vector<256x8xf32> to vector<8xf32>
    %8 = vector.shape_cast %7 : vector<8xf32> to vector<1x8xf32>
    %9 = arith.addf %6, %8 : vector<1x8xf32>
    %c0_6 = arith.constant 0 : index
    %c0_7 = arith.constant 0 : index
    %10 = vector.load %arg4[%c0_6, %c0_7] : memref<2x8xf32, #tpu.memory_space<vmem>>, vector<1x8xf32>
    tpu.vector_store %arg4[%c0_6, %c0_7], %9 {strides = array<i32>} : memref<2x8xf32, #tpu.memory_space<vmem>>, vector<1x8xf32>,
    %c1 = arith.constant 1 : index
    %c0_8 = arith.constant 0 : index
    %11 = vector.load %arg4[%c1, %c0_8] : memref<2x8xf32, #tpu.memory_space<vmem>>, vector<1x8xf32>
    %12 = arith.mulf %5, %5 : vector<256x8xf32>
    %cst_9 = arith.constant dense<0.000000e+00> : vector<8xf32>
    %13 = vector.multi_reduction <add>, %12, %cst_9 [0] : vector<256x8xf32> to vector<8xf32>
    %14 = vector.shape_cast %13 : vector<8xf32> to vector<1x8xf32>
    %15 = arith.addf %11, %14 : vector<1x8xf32>
    %c1_10 = arith.constant 1 : index
    %c0_11 = arith.constant 0 : index
    %16 = vector.load %arg4[%c1_10, %c0_11] : memref<2x8xf32, #tpu.memory_space<vmem>>, vector<1x8xf32>
    tpu.vector_store %arg4[%c1_10, %c0_11], %15 {strides = array<i32>} : memref<2x8xf32, #tpu.memory_space<vmem>>, vector<1x8xf32>,
    %c0_i32_12 = arith.constant 0 : i32
    %17 = arith.cmpi eq, %arg1, %c0_i32_12 : i32
    %18 = arith.extui %17 : i1 to i32
    %c0_i32_13 = arith.constant 0 : i32
    %19 = arith.cmpi ne, %18, %c0_i32_13 : i32
    scf.if %19 {
      %c0_14 = arith.constant 0 : index
      %c0_15 = arith.constant 0 : index
      %20 = vector.load %arg4[%c0_14, %c0_15] : memref<2x8xf32, #tpu.memory_space<vmem>>, vector<1x8xf32>
      %cst_16 = arith.constant 3.906250e-03 : f32
      %21 = vector.broadcast %cst_16 : f32 to vector<1x8xf32>
      %22 = arith.mulf %20, %21 : vector<1x8xf32>
      %c1_17 = arith.constant 1 : index
      %c0_18 = arith.constant 0 : index
      %23 = vector.load %arg4[%c1_17, %c0_18] : memref<2x8xf32, #tpu.memory_space<vmem>>, vector<1x8xf32>
      %cst_19 = arith.constant 3.906250e-03 : f32
      %24 = vector.broadcast %cst_19 : f32 to vector<1x8xf32>
      %25 = arith.mulf %23, %24 : vector<1x8xf32>
      %26 = arith.mulf %22, %22 : vector<1x8xf32>
      %27 = arith.subf %25, %26 : vector<1x8xf32>
      %cst_20 = arith.constant 0.000000e+00 : f32
      %28 = vector.broadcast %cst_20 : f32 to vector<1x8xf32>
      %29 = arith.maximumf %27, %28 : vector<1x8xf32>
      %c0_21 = arith.constant 0 : index
      %c0_22 = arith.constant 0 : index
      %c0_23 = arith.constant 0 : index
      %30 = vector.load %arg3[%c0_21, %c0_22, %c0_23] : memref<1x2x8xf32, #tpu.memory_space<vmem>>, vector<1x1x8xf32>
      %31 = vector.shape_cast %30 : vector<1x1x8xf32> to vector<1x8xf32>
      %32 = vector.shape_cast %22 : vector<1x8xf32> to vector<1x1x8xf32>
      tpu.vector_store %arg3[%c0_21, %c0_22, %c0_23], %32 {strides = array<i32>} : memref<1x2x8xf32, #tpu.memory_space<vmem>>, vector<1x1x8xf32>,
      %cst_24 = arith.constant 9.99999974E-6 : f32
      %33 = vector.broadcast %cst_24 : f32 to vector<1x8xf32>
      %34 = arith.addf %29, %33 : vector<1x8xf32>
      %35 = math.rsqrt %34 : vector<1x8xf32>
      %c0_25 = arith.constant 0 : index
      %c1_26 = arith.constant 1 : index
      %c0_27 = arith.constant 0 : index
      %36 = vector.load %arg3[%c0_25, %c1_26, %c0_27] : memref<1x2x8xf32, #tpu.memory_space<vmem>>, vector<1x1x8xf32>
      %37 = vector.shape_cast %36 : vector<1x1x8xf32> to vector<1x8xf32>
      %38 = vector.shape_cast %35 : vector<1x8xf32> to vector<1x1x8xf32>
      tpu.vector_store %arg3[%c0_25, %c1_26, %c0_27], %38 {strides = array<i32>} : memref<1x2x8xf32, #tpu.memory_space<vmem>>, vector<1x1x8xf32>,
    } else {
    }
    return
  }
  func.func @transform_0(%arg0: i32, %arg1: i32) -> (i32, i32, i32, i32) {
    %c0_i32 = arith.constant 0 : i32
    %c0_i32_0 = arith.constant 0 : i32
    %c0_i32_1 = arith.constant 0 : i32
    return %arg0, %arg1, %c0_i32, %c0_i32_0 : i32, i32, i32, i32
  }
  func.func @transform_1(%arg0: i32, %arg1: i32) -> (i32, i32, i32) {
    %c0_i32 = arith.constant 0 : i32
    %c0_i32_0 = arith.constant 0 : i32
    %c0_i32_1 = arith.constant 0 : i32
    return %arg0, %c0_i32, %c0_i32_0 : i32, i32, i32
  }
}

</mosaic_0001>

<bundles_post_ra>
// kernel: tpu_custom_call.1
= control target key start
LH: loop header
LB: loop body
LE: loop exit
PB: predicated region body
PF: predicated region fallthrough
CT: control target
= control target key end

     0   :  { %6 = vsyncpa [#allocation4], 0  ;;  %s842_s0 = inlined_call_operand.vmem [shape: f32[2,16,16,8], index: 0, kind: input, shape index: {}]   ;;  %s843_s1 = inlined_call_operand.hbm [shape: f32[2,2,8], index: 1, kind: output, shape index: {}]  }
   0x1   :  { %8 = vsyncpa [#allocation4 + $0x1], 0  ;;  %s639_s6 = smov 0   ;;  %s641_s7 = smov 0  }
   0x2   :  { %s643_s8 = smov 0   ;;  %s645_s9 = smov 0  }
   0x3   :  { %s647_s10 = smov 0   ;;  %s649_s11 = smov 0  }
   0x4 LB: > { %s477_s12 = sadd.s32 4294967295, %s626_s11   ;;  %s478_s13 = sadd.s32 4294967294, %s626_s11   ;;  %s626_s11 = sphi %s649_s11, %s14_s11   ;;  %s622_s10 = sphi %s647_s10, %s850_s10   ;;  %s618_s9 = sphi %s645_s9, %s849_s9   ;;  %s614_s8 = sphi %s643_s8, %s848_s8   ;;  %s610_s7 = sphi %s641_s7, %s847_s7   ;;  %s606_s6 = sphi %s639_s6, %s846_s6  }
   0x5   : > { %s26_s14 = sadd.s32 1, %s622_s10  ;;  %s61_s15 = sadd.s32 1, %s614_s8 }
   0x6   : > { %p28_p0 = scmp.ge.s32.totalorder %s26_s14, 2  ;;  %p71_p1 = scmp.ne.s32.totalorder %s614_s8, %s610_s7 }
   0x7   : > { %p72_p2 = scmp.eq.s32.totalorder %s477_s12, 1  ;;  %p77_p3 = scmp.ne.s32.totalorder %s610_s7, %s606_s6 }
   0x8   : > { %s852_s14 = smov (%p28_p0, %s26_s14), 0  ;;  %p78_p5 = scmp.eq.s32.totalorder %s478_s13, 1 }
   0x9   : > { %p679_p4 = por %p72_p2, %p71_p1  ;;  %s58_s17 = ssub.s32 %s622_s10, %s852_s14 }
   0xa   : > { %p481_p6 = scmp.ge.s32.totalorder %s626_s11, 1  ;;  %p59_p7 = scmp.eq.s32.totalorder %s58_s17, 0 }
   0xb   : > { %p686_p8 = por %p78_p5, %p77_p3  ;;  %p110_p9 = scmp.lt.s32.totalorder %s626_s11, 3 }
   0xc   : > { %s692_s19 = scalar_select %p59_p7, %s614_s8, %s61_s15  }
   0xd   : > { %p111_p10 = pnand %p481_p6, %p110_p9 }
   0xe   : > { %p136_p11 = scmp.lt.s32.totalorder (!%p111_p10), %s618_s9, 1  ;;  %s132_s25 = sand.u32 (!%p111_p10), 1, %s610_s7  }
   0xf   : > { %114 = sbr.rel (%p111_p10) target bundleno = 143 (0x8f), region = 24  ;;  %s482_s26 = sshll.u32 (!%p111_p10), %s132_s25, 1 }
  0x10   : > { %s134_s27 = scalar_lea.vmem (!%p111_p10), [#allocation3], %s482_s26  ;;  %s486_s28 = sshll.u32 (!%p111_p10), %s618_s9, 1 }
  0x11   : > { %s396_s2 = scalar_lea.hbm (!%p111_p10), %s843_s1, %s486_s28  ;;  %s398_s3 = sshll.u32 (!%p111_p10), %s134_s27, 4  ;;  %s399_s3 = int_to_ptr.vmem [resolvable:$true] %s398_s3 }
  0x12   : > { %s400_s4 = sshll.u32 (!%p111_p10), %s396_s2, 4  ;;  %s386_s5 = scalar_lea.sflag (!%p111_p10), [#allocation4], %s132_s25  ;;  %s401_s4 = int_to_ptr.hbm [resolvable:$true] %s400_s4 }
  0x13   : > { %s568_s17 = scalar_lea.hbm (!%p111_p10), %s843_s1, 4 }
  0x14   : > { %vm150_vm0 = vcmask 58368   ;;  %v628_v0 = vmov 0.0   ;;  %s137_s20 = scalar_select %p136_p11, %s618_s9, 1  ;;  %vm185_vm1 = vcmask 64512   ;;  %vm256_vm2 = vcmask 57344  }
  0x15   : > { %151 = vst.msk [vmem:[#allocation2] sm:$0x3] %vm150_vm0, %v628_v0  ;;  %s562_s9 = sshra.s32 %s401_s4, 4  ;;  %s563_s9 = int_to_ptr.hbm [resolvable:$true] %s562_s9 }
  0x16   : > { %s489_s21 = sshll.u32 %s137_s20, 8  ;;  %s564_s12 = scalar_lea.hbm %s563_s9, 2 }
  0x17   : > { %s699_s24 = scalar_lea.vmem %s842_s0, %s489_s21  ;;  %p565_p12 = scmp.ne.s32.totalorder %s563_s9, %s564_s12 }
  0x18   : > { %v152_v1 = vld [vmem:[%s699_s24] sm:$0xff]  ;;  %v153_v2 = vld [vmem:[%s699_s24 + $0x8] sm:$0xff]  ;;  %v154_v3 = vld [vmem:[%s699_s24 + $0x10] sm:$0xff]  ;;  %p569_p1 = scmp.lt.s32.totalorder %s563_s9, %s843_s1  ;;  %p570_p2 = scmp.lt.s32.totalorder %s568_s17, %s564_s12 }
  0x19   : > { %v155_v4 = vld [vmem:[%s699_s24 + $0x18] sm:$0xff]  ;;  %v186_v5 = vsel %vm185_vm1, %v152_v1, 0.0  ;;  %v187_v6 = vsel %vm185_vm1, %v153_v2, 0.0  ;;  %v189_v7 = vsel %vm185_vm1, %v154_v3, 0.0  ;;  %v156_v8 = vld [vmem:[%s699_s24 + $0x20] sm:$0xff]  ;;  %v157_v11 = vld [vmem:[%s699_s24 + $0x28] sm:$0xff]  ;;  %v259_v22 = vmul.f32 %v152_v1, %v152_v1  ;;  %p566_p13 = pnand %p565_p12, %p679_p4 }
  0x1a   : > { %v188_v9 = vadd.f32 %v187_v6, %v186_v5  ;;  %v191_v10 = vsel %vm185_vm1, %v155_v4, 0.0  ;;  %v193_v13 = vsel %vm185_vm1, %v156_v8, 0.0  ;;  %v158_v14 = vld [vmem:[%s699_s24 + $0x30] sm:$0xff]  ;;  %v195_v16 = vsel %vm185_vm1, %v157_v11, 0.0  ;;  %v159_v17 = vld [vmem:[%s699_s24 + $0x38] sm:$0xff]  ;;  %v160_v20 = vld [vmem:[%s699_s24 + $0x40] sm:$0xff]  ;;  %p571_p3 = por %p570_p2, %p569_p1 }
  0x1b   : > { %v197_v19 = vsel %vm185_vm1, %v158_v14, 0.0  ;;  %v199_v23 = vsel %vm185_vm1, %v159_v17, 0.0  ;;  %v260_v24 = vmul.f32 %v153_v2, %v153_v2  ;;  %v261_v25 = vmul.f32 %v154_v3, %v154_v3  ;;  %v161_v26 = vld [vmem:[%s699_s24 + $0x48] sm:$0xff]  ;;  %v162_v30 = vld [vmem:[%s699_s24 + $0x50] sm:$0xff]  ;;  %v163_v37 = vld [vmem:[%s699_s24 + $0x58] sm:$0xff]  ;;  %p567_p0 = pneg %p566_p13 }
  0x1c   : > { %v190_v12 = vadd.f32 %v189_v7, %v188_v9  ;;  %v201_v28 = vsel %vm185_vm1, %v160_v20, 0.0  ;;  %v262_v29 = vmul.f32 %v155_v4, %v155_v4  ;;  %v291_v32 = vsel %vm185_vm1, %v259_v22, 0.0  ;;  %v164_v43 = vld [vmem:[%s699_s24 + $0x60] sm:$0xff]  ;;  %v165_v49 = vld [vmem:[%s699_s24 + $0x68] sm:$0xff]  ;;  %v166_v55 = vld [vmem:[%s699_s24 + $0x70] sm:$0xff] }
  0x1d   : > { %v203_v33 = vsel %vm185_vm1, %v161_v26, 0.0  ;;  %v263_v34 = vmul.f32 %v156_v8, %v156_v8  ;;  %v292_v35 = vsel %vm185_vm1, %v260_v24, 0.0  ;;  %v294_v36 = vsel %vm185_vm1, %v261_v25, 0.0  ;;  %v167_v61 = vld [vmem:[%s699_s24 + $0x78] sm:$0xff]  ;;  %v168_v3 = vld [vmem:[%s699_s24 + $0x80] sm:$0xff]  ;;  %v169_v9 = vld [vmem:[%s699_s24 + $0x88] sm:$0xff]  ;;  %p572_p5 = pnand %p571_p3, %p567_p0 }
  0x1e   : > { %v192_v15 = vadd.f32 %v191_v10, %v190_v12  ;;  %v293_v39 = vadd.f32 %v292_v35, %v291_v32  ;;  %v205_v40 = vsel %vm185_vm1, %v162_v30, 0.0  ;;  %v264_v41 = vmul.f32 %v157_v11, %v157_v11 }
  0x1f   : > { %v296_v42 = vsel %vm185_vm1, %v262_v29, 0.0  ;;  %v207_v46 = vsel %vm185_vm1, %v163_v37, 0.0  ;;  %v265_v47 = vmul.f32 %v158_v14, %v158_v14  ;;  %v298_v48 = vsel %vm185_vm1, %v263_v34, 0.0 }
  0x20   : > { %v194_v18 = vadd.f32 %v193_v13, %v192_v15  ;;  %v295_v45 = vadd.f32 %v294_v36, %v293_v39  ;;  %v209_v52 = vsel %vm185_vm1, %v164_v43, 0.0  ;;  %v266_v53 = vmul.f32 %v159_v17, %v159_v17  ;;  %v170_v15 = vld [vmem:[%s699_s24 + $0x90] sm:$0xff] }
  0x21   : > { %v300_v54 = vsel %vm185_vm1, %v264_v41, 0.0  ;;  %v211_v58 = vsel %vm185_vm1, %v165_v49, 0.0  ;;  %v267_v59 = vmul.f32 %v160_v20, %v160_v20  ;;  %v302_v60 = vsel %vm185_vm1, %v265_v47, 0.0  ;;  %v174_v39 = vld [vmem:[%s699_s24 + $0xb0] sm:$0xff] }
  0x22   : > { %v196_v21 = vadd.f32 %v195_v16, %v194_v18  ;;  %v297_v51 = vadd.f32 %v296_v42, %v295_v45  ;;  %v213_v0 = vsel %vm185_vm1, %v166_v55, 0.0  ;;  %v268_v1 = vmul.f32 %v161_v26, %v161_v26  ;;  %v175_v45 = vld [vmem:[%s699_s24 + $0xb8] sm:$0xff] }
  0x23   : > { %v304_v2 = vsel %vm185_vm1, %v266_v53, 0.0  ;;  %v215_v6 = vsel %vm185_vm1, %v167_v61, 0.0  ;;  %v269_v7 = vmul.f32 %v162_v30, %v162_v30  ;;  %v306_v8 = vsel %vm185_vm1, %v267_v59, 0.0 }
  0x24   : > { %v198_v27 = vadd.f32 %v197_v19, %v196_v21  ;;  %v299_v57 = vadd.f32 %v298_v48, %v297_v51  ;;  %v217_v12 = vsel %vm185_vm1, %v168_v3, 0.0  ;;  %v270_v13 = vmul.f32 %v163_v37, %v163_v37  ;;  %v171_v21 = vld [vmem:[%s699_s24 + $0x98] sm:$0xff]  ;;  %v176_v51 = vld [vmem:[%s699_s24 + $0xc0] sm:$0xff] }
  0x25   : > { %v308_v14 = vsel %vm185_vm1, %v268_v1, 0.0  ;;  %v219_v18 = vsel %vm185_vm1, %v169_v9, 0.0  ;;  %v271_v19 = vmul.f32 %v164_v43, %v164_v43  ;;  %v310_v20 = vsel %vm185_vm1, %v269_v7, 0.0 }
  0x26   : > { %v200_v31 = vadd.f32 %v199_v23, %v198_v27  ;;  %v301_v63 = vadd.f32 %v300_v54, %v299_v57  ;;  %v221_v24 = vsel %vm185_vm1, %v170_v15, 0.0  ;;  %v272_v25 = vmul.f32 %v165_v49, %v165_v49  ;;  %v172_v27 = vld [vmem:[%s699_s24 + $0xa0] sm:$0xff]  ;;  %v177_v57 = vld [vmem:[%s699_s24 + $0xc8] sm:$0xff] }
  0x27   : > { %v312_v26 = vsel %vm185_vm1, %v270_v13, 0.0  ;;  %v223_v30 = vsel %vm185_vm1, %v171_v21, 0.0  ;;  %v314_v32 = vsel %vm185_vm1, %v271_v19, 0.0  ;;  %v225_v36 = vsel %vm185_vm1, %v172_v27, 0.0 }
  0x28   : > { %v202_v38 = vadd.f32 %v201_v28, %v200_v31  ;;  %v303_v5 = vadd.f32 %v302_v60, %v301_v63  ;;  %v273_v31 = vmul.f32 %v166_v55, %v166_v55  ;;  %v274_v37 = vmul.f32 %v167_v61, %v167_v61  ;;  %v178_v63 = vld [vmem:[%s699_s24 + $0xd0] sm:$0xff] }
  0x29   : > { %v275_v43 = vmul.f32 %v168_v3, %v168_v3  ;;  %v229_v48 = vsel %vm185_vm1, %v174_v39, 0.0  ;;  %v276_v49 = vmul.f32 %v169_v9, %v169_v9  ;;  %v231_v54 = vsel %vm185_vm1, %v175_v45, 0.0 }
  0x2a   : > { %v204_v44 = vadd.f32 %v203_v33, %v202_v38  ;;  %v305_v11 = vadd.f32 %v304_v2, %v303_v5  ;;  %v173_v33 = vld [vmem:[%s699_s24 + $0xa8] sm:$0xff]  ;;  %v316_v38 = vsel %vm185_vm1, %v272_v25, 0.0  ;;  %v277_v55 = vmul.f32 %v170_v15, %v170_v15  ;;  %v179_v5 = vld [vmem:[%s699_s24 + $0xd8] sm:$0xff] }
  0x2b   : > { %v227_v42 = vsel %vm185_vm1, %v173_v33, 0.0  ;;  %v233_v60 = vsel %vm185_vm1, %v176_v51, 0.0  ;;  %v278_v61 = vmul.f32 %v171_v21, %v171_v21  ;;  %v235_v2 = vsel %vm185_vm1, %v177_v57, 0.0 }
  0x2c   : > { %v206_v50 = vadd.f32 %v205_v40, %v204_v44  ;;  %v307_v17 = vadd.f32 %v306_v8, %v305_v11  ;;  %v318_v44 = vsel %vm185_vm1, %v273_v31, 0.0  ;;  %v279_v3 = vmul.f32 %v172_v27, %v172_v27  ;;  %v180_v11 = vld [vmem:[%s699_s24 + $0xe0] sm:$0xff] }
  0x2d   : > { %v237_v8 = vsel %vm185_vm1, %v178_v63, 0.0  ;;  %v280_v9 = vmul.f32 %v173_v33, %v173_v33  ;;  %v281_v15 = vmul.f32 %v174_v39, %v174_v39  ;;  %v282_v21 = vmul.f32 %v175_v45, %v175_v45 }
  0x2e   : > { %v208_v56 = vadd.f32 %v207_v46, %v206_v50  ;;  %v309_v23 = vadd.f32 %v308_v14, %v307_v17  ;;  %v320_v50 = vsel %vm185_vm1, %v274_v37, 0.0  ;;  %v239_v14 = vsel %vm185_vm1, %v179_v5, 0.0  ;;  %v181_v17 = vld [vmem:[%s699_s24 + $0xe8] sm:$0xff] }
  0x2f   : > { %v283_v27 = vmul.f32 %v176_v51, %v176_v51  ;;  %v284_v33 = vmul.f32 %v177_v57, %v177_v57 }
  0x30   : > { %v210_v62 = vadd.f32 %v209_v52, %v208_v56  ;;  %v311_v29 = vadd.f32 %v310_v20, %v309_v23  ;;  %v322_v56 = vsel %vm185_vm1, %v275_v43, 0.0  ;;  %v241_v20 = vsel %vm185_vm1, %v180_v11, 0.0  ;;  %v182_v23 = vld [vmem:[%s699_s24 + $0xf0] sm:$0xff] }
  0x31   : > { %v338_v39 = vsel %vm185_vm1, %v283_v27, 0.0  ;;  %v340_v43 = vsel %vm185_vm1, %v284_v33, 0.0 }
  0x32   : > { %v212_v4 = vadd.f32 %v211_v58, %v210_v62  ;;  %v313_v35 = vadd.f32 %v312_v26, %v311_v29  ;;  %v324_v62 = vsel %vm185_vm1, %v276_v49, 0.0  ;;  %v243_v26 = vsel %vm185_vm1, %v181_v17, 0.0  ;;  %v183_v29 = vld [vmem:[%s699_s24 + $0xf8] sm:$0xff] }
  0x33   : > { %v247_v37 = vsel %vm185_vm1, %v183_v29, 0.0 }
  0x34   : > { %v214_v10 = vadd.f32 %v213_v0, %v212_v4  ;;  %v315_v41 = vadd.f32 %v314_v32, %v313_v35  ;;  %v326_v4 = vsel %vm185_vm1, %v277_v55, 0.0  ;;  %v245_v32 = vsel %vm185_vm1, %v182_v23, 0.0 }
  0x36   : > { %v216_v16 = vadd.f32 %v215_v6, %v214_v10  ;;  %v317_v47 = vadd.f32 %v316_v38, %v315_v41  ;;  %v328_v10 = vsel %vm185_vm1, %v278_v61, 0.0  ;;  %v285_v38 = vmul.f32 %v178_v63, %v178_v63 }
  0x38   : > { %v218_v22 = vadd.f32 %v217_v12, %v216_v16  ;;  %v319_v53 = vadd.f32 %v318_v44, %v317_v47  ;;  %v330_v16 = vsel %vm185_vm1, %v279_v3, 0.0  ;;  %v342_v47 = vsel %vm185_vm1, %v285_v38, 0.0 }
  0x3a   : > { %v220_v28 = vadd.f32 %v219_v18, %v218_v22  ;;  %v321_v59 = vadd.f32 %v320_v50, %v319_v53  ;;  %v332_v22 = vsel %vm185_vm1, %v280_v9, 0.0  ;;  %v288_v50 = vmul.f32 %v181_v17, %v181_v17 }
  0x3c   : > { %v222_v34 = vadd.f32 %v221_v24, %v220_v28  ;;  %v323_v1 = vadd.f32 %v322_v56, %v321_v59  ;;  %v334_v28 = vsel %vm185_vm1, %v281_v15, 0.0  ;;  %v348_v59 = vsel %vm185_vm1, %v288_v50, 0.0  ;;  %v258_v15 = vld [vmem:[#allocation2 + $0x1] sm:$0x1] }
  0x3e   : > { %v224_v40 = vadd.f32 %v223_v30, %v222_v34  ;;  %v325_v7 = vadd.f32 %v324_v62, %v323_v1  ;;  %v336_v34 = vsel %vm185_vm1, %v282_v21, 0.0  ;;  %v184_v1 = vld [vmem:[#allocation2] sm:$0x1] }
  0x40   : > { %v226_v46 = vadd.f32 %v225_v36, %v224_v40  ;;  %v327_v13 = vadd.f32 %v326_v4, %v325_v7 }
  0x42   : > { %v228_v52 = vadd.f32 %v227_v42, %v226_v46  ;;  %v329_v19 = vadd.f32 %v328_v10, %v327_v13  ;;  %v286_v42 = vmul.f32 %v179_v5, %v179_v5  ;;  %v287_v46 = vmul.f32 %v180_v11, %v180_v11 }
  0x44   : > { %v230_v58 = vadd.f32 %v229_v48, %v228_v52  ;;  %v331_v25 = vadd.f32 %v330_v16, %v329_v19  ;;  %v344_v51 = vsel %vm185_vm1, %v286_v42, 0.0  ;;  %v346_v55 = vsel %vm185_vm1, %v287_v46, 0.0 }
  0x46   : > { %v232_v0 = vadd.f32 %v231_v54, %v230_v58  ;;  %v333_v31 = vadd.f32 %v332_v22, %v331_v25  ;;  %v289_v54 = vmul.f32 %v182_v23, %v182_v23  ;;  %v290_v58 = vmul.f32 %v183_v29, %v183_v29 }
  0x48   : > { %v234_v6 = vadd.f32 %v233_v60, %v232_v0  ;;  %v335_v36 = vadd.f32 %v334_v28, %v333_v31  ;;  %v350_v62 = vsel %vm185_vm1, %v289_v54, 0.0 }
  0x4a   : > { %v236_v12 = vadd.f32 %v235_v2, %v234_v6  ;;  %v337_v41 = vadd.f32 %v336_v34, %v335_v36  ;;  %v352_v2 = vsel %vm185_vm1, %v290_v58, 0.0 }
  0x4c   : > { %v238_v18 = vadd.f32 %v237_v8, %v236_v12  ;;  %v339_v45 = vadd.f32 %v338_v39, %v337_v41 }
  0x4e   : > { %v240_v24 = vadd.f32 %v239_v14, %v238_v18  ;;  %v341_v49 = vadd.f32 %v340_v43, %v339_v45 }
  0x50   : > { %v242_v30 = vadd.f32 %v241_v20, %v240_v24  ;;  %v343_v53 = vadd.f32 %v342_v47, %v341_v49 }
  0x52   : > { %v244_v35 = vadd.f32 %v243_v26, %v242_v30  ;;  %v345_v57 = vadd.f32 %v344_v51, %v343_v53 }
  0x54   : > { %v246_v40 = vadd.f32 %v245_v32, %v244_v35  ;;  %v347_v61 = vadd.f32 %v346_v55, %v345_v57 }
  0x56   : > { %v248_v44 = vadd.f32 %v247_v37, %v246_v40  ;;  %v349_v0 = vadd.f32 %v348_v59, %v347_v61 }
  0x58   : > { %v249_v48 = vrot.slane %v248_v44, 4  ;;  %v351_v4 = vadd.f32 %v350_v62, %v349_v0 }
  0x5a   : > { %v250_v52 = vadd.f32 %v249_v48, %v248_v44  ;;  %v353_v6 = vadd.f32 %v352_v2, %v351_v4 }
  0x5c   : > { %v251_v56 = vrot.slane %v250_v52, 2  ;;  %v354_v7 = vrot.slane %v353_v6, 4 }
  0x5e   : > { %v252_v60 = vadd.f32 %v251_v56, %v250_v52  ;;  %v355_v8 = vadd.f32 %v354_v7, %v353_v6 }
  0x60   : > { %v253_v63 = vrot.slane %v252_v60, 1  ;;  %v356_v9 = vrot.slane %v355_v8, 2 }
  0x62   : > { %v254_v3 = vadd.f32 %v253_v63, %v252_v60  ;;  %v357_v10 = vadd.f32 %v356_v9, %v355_v8 }
  0x64   : > { %v255_v5 = vadd.f32 %v254_v3, %v184_v1  ;;  %v358_v12 = vrot.slane %v357_v10, 1 }
  0x66   : > { %257 = vst.msk [vmem:[#allocation2] sm:$0x1] %vm256_vm2, %v255_v5  ;;  %v359_v14 = vadd.f32 %v358_v12, %v357_v10 }
  0x68   : > { %v360_v16 = vadd.f32 %v359_v14, %v258_v15 }
  0x6a   : > { %361 = vst.msk [vmem:[#allocation2 + $0x1] sm:$0x1] %vm256_vm2, %v360_v16 }
  0x6d   : > { %v365_v11 = vld [vmem:[#allocation2] sm:$0x1] }
  0x6e   : > { %v366_v13 = vmul.f32 0.00390625, %v365_v11 }
  0x70   : > { %372 = vst.msk [vmem:[%s134_s27] sm:$0x1] %vm256_vm2, %v366_v13  ;;  %v369_v17 = vmul.f32 %v366_v13, %v366_v13 }
  0x71   : > { %v367_v18 = vld [vmem:[#allocation2 + $0x1] sm:$0x1] }
  0x72   : > { %v368_v19 = vmul.f32 0.00390625, %v367_v18 }
  0x74   : > { %v370_v20 = vsub.f32 %v368_v19, %v369_v17 }
  0x76   : > { %v371_v21 = vmax.f32 %v370_v20, 0.0 }
  0x78   : > { %v373_v22 = vadd.f32 1e-05, %v371_v21 }
  0x7a   : > { %546 = vrsqrt.f32 %v373_v22  ;;  %vm380_vm4 = vweird.f32 %v373_v22 }
  0x80   : > { %v547_v23 = vpop.eup %546 }
  0x81   : > { %v375_v24 = vmul.f32 %v547_v23, %v373_v22  ;;  %vm381_vm3 = vweird.f32 %v547_v23 }
  0x82   : > { %vm382_vm5 = vmor %vm380_vm4, %vm381_vm3 }
  0x83   : > { %v376_v25 = vmul.f32 %v547_v23, %v375_v24 }
  0x85   : > { %v377_v26 = vmul.f32 0.5, %v376_v25 }
  0x87   : > { %v378_v27 = vsub.f32 1.5, %v377_v26 }
  0x89   : > { %v379_v28 = vmul.f32 %v547_v23, %v378_v27 }
  0x8b   : > { %v383_v29 = vsel %vm382_vm5, %v547_v23, %v379_v28 }
  0x8c   : > { %384 = vst.msk [vmem:[%s134_s27 + $0x1] sm:$0x1] %vm256_vm2, %v383_v29 }
  0x8d   : > { %575 = shalt.err (!%p572_p5)
}
  0x8e   : > { %490 = dma.vmem_to_hbm [thread:$0]  (%p679_p4), %s399_s3, 32, %s401_s4, %s386_s5  }
  0x8f PF: > { %p496_p6 = scmp.ge.s32.totalorder %s626_s11, 2  ;;  %s412_s22 = sand.u32 1, %s606_s6  }
  0x90   : > { %s413_s23 = scalar_lea.sflag [#allocation4], %s412_s22 }
  0x91   : > { %p493_p7 = pnand %p496_p6, %p686_p8 }
  0x93   : > { %p494_p9 = pneg %p493_p7 }
  0x95   : > { %601 = dma.done.wait (%p494_p9), %s413_s23, 32  }
  0x96   : > { %603 = vsyncadd (%p494_p9), %s413_s23, 4294967264  ;;  %s14_s11 = sadd.s32 1, %s626_s11   ;;  %s846_s6 = smov %s610_s7 }
  0x97   : > { %p11_p10 = scmp.ge.s32.totalorder %s14_s11, 4   ;;  %s847_s7 = smov %s614_s8 }
  0x98   : > { %s848_s8 = smov %s692_s19  ;;  %s849_s9 = smov %s622_s10 }
  0x99   : > { %s850_s10 = smov %s852_s14  ;;  %13 = sbr.rel (!%p11_p10) target bundleno = 4 (0x4), region = 67 }
  0x9e   :  { %419 = vsyncpa [#allocation4], 1 }
  0x9f   :  { %421 = vsyncpa [#allocation4 + $0x1], 1 }

</bundles_post_ra>
